<compile_context>
chip_gen: v7x
topology: tpu7x:2x2x1
jax: 0.10.0
libtpu: 0.0.40
codegen_flags: <defaults>
</compile_context>

<pallas_src>
import functools

import jax
import jax.numpy as jnp
from jax.experimental import pallas as pl
from jax.experimental.pallas import tpu as pltpu

H1, H2, H3 = 256, 128, 64          # trunk widths
HOUT = 4                           # fused head width (2 mean || 2 std)
HOUT_PAD = 128                     # lane-dense padded head / output width
# 128-lane-aligned offsets of each bias segment inside the packed bias buffer.
B1_OFF, B2_OFF, B3_OFF, BH_OFF = 0, 256, 384, 512
BIAS_LEN = BH_OFF + HOUT_PAD       # 640


def actor_forward_kernel(x_ref, w1_ref, w2_ref, w3_ref, wh_ref, b_ref, out_ref):
    """One batch tile: 3x (matmul + bias + ReLU) trunk, then fused lane-dense mean||std head."""
    x = x_ref[...].astype(jnp.bfloat16)
    h = jnp.dot(x, w1_ref[...], preferred_element_type=jnp.float32)
    h = jnp.maximum(h + b_ref[:, B1_OFF:B1_OFF + H1], 0.0)
    h = jnp.dot(h.astype(jnp.bfloat16), w2_ref[...], preferred_element_type=jnp.float32)
    h = jnp.maximum(h + b_ref[:, B2_OFF:B2_OFF + H2], 0.0)
    h = jnp.dot(h.astype(jnp.bfloat16), w3_ref[...], preferred_element_type=jnp.float32)
    h = jnp.maximum(h + b_ref[:, B3_OFF:B3_OFF + H3], 0.0)
    out = jnp.dot(h.astype(jnp.bfloat16), wh_ref[...], preferred_element_type=jnp.float32)
    out_ref[...] = out + b_ref[:, BH_OFF:BH_OFF + HOUT_PAD]   # full 128-lane unmasked store


def _round_up(n, m):
    return (n + m - 1) // m * m


def _cdiv(a, b):
    return (a + b - 1) // b


def actor_forward(x, packed, *, block_b=2048):
    """x: [B, state_size] f32. packed: output of pack_actor_params. Returns (mean, std) [B,2]."""
    B, S = x.shape

    # Largest sublane-aligned batch tile under block_b; ~5-6 KB of f32/bf16 intermediates per
    # row, so block_b=2048 stays within the 48 MiB scoped-VMEM budget set below (and well
    # under v7x's 64 MiB physical VMEM per TensorCore).
    TB = min(block_b, _round_up(B, 8))
    # Guarantee >= 2 grid steps on the "parallel" batch axis when the batch allows it, so both
    # v7x TensorCores get work (no-op on single-TC v5e/v6e).
    if B > 8 and _cdiv(B, TB) < 2:
        TB = _round_up(_cdiv(B, 2), 8)
    nb = _cdiv(B, TB)   # Pallas handles the partial edge tile; no wrapper-side jnp.pad of x.

    flops = 2 * B * (S * H1 + H1 * H2 + H2 * H3 + H3 * HOUT_PAD)
    bytes_accessed = (
        x.size * 4
        + (S * H1 + H1 * H2 + H2 * H3 + H3 * HOUT_PAD) * 2   # bf16 weights
        + BIAS_LEN * 4
        + B * HOUT_PAD * 4                                    # lane-dense f32 output
    )

    const = lambda i: (0, 0)                      # weights/biases: resident across batch tiles
    out = pl.pallas_call(
        actor_forward_kernel,
        out_shape=jax.ShapeDtypeStruct((B, HOUT_PAD), jnp.float32),
        grid=(nb,),
        in_specs=[
            pl.BlockSpec((TB, S), lambda i: (i, 0)),           # x (batch-tiled, pipelined)
            pl.BlockSpec((S, H1), const),                      # w1 (bf16)
            pl.BlockSpec((H1, H2), const),                     # w2 (bf16)
            pl.BlockSpec((H2, H3), const),                     # w3 (bf16)
            pl.BlockSpec((H3, HOUT_PAD), const),               # fused head weight, 128-lane padded
            pl.BlockSpec((1, BIAS_LEN), const),                # packed biases (f32)
        ],
        out_specs=pl.BlockSpec((TB, HOUT_PAD), lambda i: (i, 0)),  # lane-dense mean||std||zeros
        compiler_params=pltpu.CompilerParams(
            dimension_semantics=("parallel",),                 # v7x: batch split over both TCs
            vmem_limit_bytes=48 * 1024 * 1024,                 # headroom under v7x 64 MiB VMEM
        ),
        cost_estimate=pl.CostEstimate(
            flops=flops, transcendentals=0, bytes_accessed=bytes_accessed),
    )(x, packed["w1"], packed["w2"], packed["w3"], packed["wh"], packed["b"])

    mean = out[:, 0:2]
    std = out[:, 2:4]
    return mean, std


def init_actor_params(key, state_size):
    """Deterministic init matching nn.Linear's default U(-1/sqrt(fan_in), 1/sqrt(fan_in))."""
    def linear(key, fan_in, fan_out):
        kw, kb = jax.random.split(key)
        bound = 1.0 / jnp.sqrt(float(fan_in))
        w = jax.random.uniform(kw, (fan_in, fan_out), jnp.float32, -bound, bound)
        b = jax.random.uniform(kb, (fan_out,), jnp.float32, -bound, bound)
        return w, b

    k1, k2, k3, k4, k5 = jax.random.split(key, 5)
    w1, b1 = linear(k1, state_size, H1)
    w2, b2 = linear(k2, H1, H2)
    w3, b3 = linear(k3, H2, H3)
    wm, bm = linear(k4, H3, 2)
    ws, bs = linear(k5, H3, 2)
    return dict(w1=w1, b1=b1, w2=w2, b2=b2, w3=w3, b3=b3, wm=wm, bm=bm, ws=ws, bs=bs)


def pack_actor_params(p):
    """Host-side packing: fuse + 128-lane-pad heads, cast weights to bf16, pack biases."""
    wh = jnp.concatenate([p["wm"], p["ws"]], axis=1)              # [64, 4]  (mean || std)
    wh = jnp.pad(wh, ((0, 0), (0, HOUT_PAD - HOUT)))              # [64, 128] lane-dense
    bh = jnp.concatenate([p["bm"], p["bs"]], axis=0)              # [4]
    b = jnp.zeros((1, BIAS_LEN), jnp.float32)
    b = b.at[0, B1_OFF:B1_OFF + H1].set(p["b1"])
    b = b.at[0, B2_OFF:B2_OFF + H2].set(p["b2"])
    b = b.at[0, B3_OFF:B3_OFF + H3].set(p["b3"])
    b = b.at[0, BH_OFF:BH_OFF + HOUT].set(bh)                     # rest of head segment stays 0
    return dict(
        w1=p["w1"].astype(jnp.bfloat16),
        w2=p["w2"].astype(jnp.bfloat16),
        w3=p["w3"].astype(jnp.bfloat16),
        wh=wh.astype(jnp.bfloat16),
        b=b,
    )


def actor_forward_ref(x, p):
    """Pure-JAX reference mirroring the kernel's bf16-weight / f32-accumulate numerics."""
    def mm(a, w):
        return jnp.dot(a.astype(jnp.bfloat16), w.astype(jnp.bfloat16),
                       preferred_element_type=jnp.float32)
    h = jnp.maximum(mm(x, p["w1"]) + p["b1"], 0.0)
    h = jnp.maximum(mm(h, p["w2"]) + p["b2"], 0.0)
    h = jnp.maximum(mm(h, p["w3"]) + p["b3"], 0.0)
    return mm(h, p["wm"]) + p["bm"], mm(h, p["ws"]) + p["bs"]


if __name__ == "__main__":
    # TODO(synk): Actor.sample() (Normal.rsample + tanh squashing + log_prob correction) is not
    # part of forward(); only forward() is implemented as a kernel.
    state_size = 8
    batch = 16          # small; with block_b=8 this exercises a 2-step "parallel" batch grid

    key = jax.random.PRNGKey(0)
    k_params, k_x = jax.random.split(key)
    params = init_actor_params(k_params, state_size)
    packed = pack_actor_params(params)
    x = jax.random.normal(k_x, (batch, state_size), jnp.float32)

    fwd = jax.jit(functools.partial(actor_forward, block_b=8))
    mean, std = fwd(x, packed)
    jax.block_until_ready((mean, std))

    mean_ref, std_ref = actor_forward_ref(x, params)
    assert mean.shape == (batch, 2) and std.shape == (batch, 2)
    assert jnp.allclose(mean, mean_ref, atol=2e-3, rtol=2e-2), \
        float(jnp.max(jnp.abs(mean - mean_ref)))
    assert jnp.allclose(std, std_ref, atol=2e-3, rtol=2e-2), \
        float(jnp.max(jnp.abs(std - std_ref)))

    print("KERNEL_OK")
</pallas_src>

<mosaic_0001>
module attributes {stable_mosaic.version = 11 : i64} {
  func.func @actor_forward_kernel(%arg0: i32, %arg1: memref<8x8xf32, #tpu.memory_space<vmem>>, %arg2: memref<8x256xbf16, #tpu.memory_space<vmem>>, %arg3: memref<256x128xbf16, #tpu.memory_space<vmem>>, %arg4: memref<128x64xbf16, #tpu.memory_space<vmem>>, %arg5: memref<64x128xbf16, #tpu.memory_space<vmem>>, %arg6: memref<1x640xf32, #tpu.memory_space<vmem>>, %arg7: memref<8x128xf32, #tpu.memory_space<vmem>>) attributes {dimension_semantics = [#tpu.dimension_semantics<parallel>], iteration_bounds = array<i64: 2>, scalar_prefetch = 0 : i64, scratch_operands = 0 : i64, tpu.core_type = #tpu.core_type<tc>, window_params = [{transform_indices = @transform_0, window_bounds = array<i64: 8, 8>}, {pipeline_mode = #tpu.pipeline_mode<synchronous>, transform_indices = @transform_1, window_bounds = array<i64: 8, 256>}, {pipeline_mode = #tpu.pipeline_mode<synchronous>, transform_indices = @transform_2, window_bounds = array<i64: 256, 128>}, {pipeline_mode = #tpu.pipeline_mode<synchronous>, transform_indices = @transform_3, window_bounds = array<i64: 128, 64>}, {pipeline_mode = #tpu.pipeline_mode<synchronous>, transform_indices = @transform_4, window_bounds = array<i64: 64, 128>}, {pipeline_mode = #tpu.pipeline_mode<synchronous>, transform_indices = @transform_5, window_bounds = array<i64: 1, 640>}, {transform_indices = @transform_6, window_bounds = array<i64: 8, 128>}]} {
    %c0 = arith.constant 0 : index
    %c0_0 = arith.constant 0 : index
    %0 = vector.load %arg1[%c0, %c0_0] : memref<8x8xf32, #tpu.memory_space<vmem>>, vector<8x8xf32>
    %1 = arith.truncf %0 : vector<8x8xf32> to vector<8x8xbf16>
    %c0_1 = arith.constant 0 : index
    %c0_2 = arith.constant 0 : index
    %2 = vector.load %arg2[%c0_1, %c0_2] : memref<8x256xbf16, #tpu.memory_space<vmem>>, vector<8x256xbf16>
    %cst = arith.constant dense<0.000000e+00> : vector<8x256xf32>
    %3 = tpu.matmul %1, %2, %cst {dimension_numbers = #tpu.dot_dimension_numbers<[1], [0], [0], [1], [0, 0, 1, 1], [], []>} : vector<8x8xbf16>, vector<8x256xbf16>, vector<8x256xf32> -> vector<8x256xf32>
    %c0_3 = arith.constant 0 : index
    %c0_4 = arith.constant 0 : index
    %4 = vector.load %arg6[%c0_3, %c0_4] : memref<1x640xf32, #tpu.memory_space<vmem>>, vector<1x256xf32>
    %5 = vector.broadcast %4 : vector<1x256xf32> to vector<8x256xf32>
    %6 = arith.addf %3, %5 : vector<8x256xf32>
    %cst_5 = arith.constant 0.000000e+00 : f32
    %7 = vector.broadcast %cst_5 : f32 to vector<8x256xf32>
    %8 = arith.maximumf %6, %7 : vector<8x256xf32>
    %9 = arith.truncf %8 : vector<8x256xf32> to vector<8x256xbf16>
    %c0_6 = arith.constant 0 : index
    %c0_7 = arith.constant 0 : index
    %10 = vector.load %arg3[%c0_6, %c0_7] : memref<256x128xbf16, #tpu.memory_space<vmem>>, vector<256x128xbf16>
    %cst_8 = arith.constant dense<0.000000e+00> : vector<8x128xf32>
    %11 = tpu.matmul %9, %10, %cst_8 {dimension_numbers = #tpu.dot_dimension_numbers<[1], [0], [0], [1], [0, 0, 1, 1], [], []>} : vector<8x256xbf16>, vector<256x128xbf16>, vector<8x128xf32> -> vector<8x128xf32>
    %c0_9 = arith.constant 0 : index
    %c256 = arith.constant 256 : index
    %12 = vector.load %arg6[%c0_9, %c256] : memref<1x640xf32, #tpu.memory_space<vmem>>, vector<1x128xf32>
    %13 = vector.broadcast %12 : vector<1x128xf32> to vector<8x128xf32>
    %14 = arith.addf %11, %13 : vector<8x128xf32>
    %cst_10 = arith.constant 0.000000e+00 : f32
    %15 = vector.broadcast %cst_10 : f32 to vector<8x128xf32>
    %16 = arith.maximumf %14, %15 : vector<8x128xf32>
    %17 = arith.truncf %16 : vector<8x128xf32> to vector<8x128xbf16>
    %c0_11 = arith.constant 0 : index
    %c0_12 = arith.constant 0 : index
    %18 = vector.load %arg4[%c0_11, %c0_12] : memref<128x64xbf16, #tpu.memory_space<vmem>>, vector<128x64xbf16>
    %cst_13 = arith.constant dense<0.000000e+00> : vector<8x64xf32>
    %19 = tpu.matmul %17, %18, %cst_13 {dimension_numbers = #tpu.dot_dimension_numbers<[1], [0], [0], [1], [0, 0, 1, 1], [], []>} : vector<8x128xbf16>, vector<128x64xbf16>, vector<8x64xf32> -> vector<8x64xf32>
    %c0_14 = arith.constant 0 : index
    %c384 = arith.constant 384 : index
    %20 = vector.load %arg6[%c0_14, %c384] : memref<1x640xf32, #tpu.memory_space<vmem>>, vector<1x64xf32>
    %21 = vector.broadcast %20 : vector<1x64xf32> to vector<8x64xf32>
    %22 = arith.addf %19, %21 : vector<8x64xf32>
    %cst_15 = arith.constant 0.000000e+00 : f32
    %23 = vector.broadcast %cst_15 : f32 to vector<8x64xf32>
    %24 = arith.maximumf %22, %23 : vector<8x64xf32>
    %25 = arith.truncf %24 : vector<8x64xf32> to vector<8x64xbf16>
    %c0_16 = arith.constant 0 : index
    %c0_17 = arith.constant 0 : index
    %26 = vector.load %arg5[%c0_16, %c0_17] : memref<64x128xbf16, #tpu.memory_space<vmem>>, vector<64x128xbf16>
    %cst_18 = arith.constant dense<0.000000e+00> : vector<8x128xf32>
    %27 = tpu.matmul %25, %26, %cst_18 {dimension_numbers = #tpu.dot_dimension_numbers<[1], [0], [0], [1], [0, 0, 1, 1], [], []>} : vector<8x64xbf16>, vector<64x128xbf16>, vector<8x128xf32> -> vector<8x128xf32>
    %c0_19 = arith.constant 0 : index
    %c512 = arith.constant 512 : index
    %28 = vector.load %arg6[%c0_19, %c512] : memref<1x640xf32, #tpu.memory_space<vmem>>, vector<1x128xf32>
    %29 = vector.broadcast %28 : vector<1x128xf32> to vector<8x128xf32>
    %30 = arith.addf %27, %29 : vector<8x128xf32>
    %c0_20 = arith.constant 0 : index
    %c0_21 = arith.constant 0 : index
    %31 = vector.load %arg7[%c0_20, %c0_21] : memref<8x128xf32, #tpu.memory_space<vmem>>, vector<8x128xf32>
    tpu.vector_store %arg7[%c0_20, %c0_21], %30 {strides = array<i32>} : memref<8x128xf32, #tpu.memory_space<vmem>>, vector<8x128xf32>,
    return
  }
  func.func @transform_0(%arg0: i32) -> (i32, i32) {
    %c0_i32 = arith.constant 0 : i32
    %c0_i32_0 = arith.constant 0 : i32
    return %arg0, %c0_i32 : i32, i32
  }
  func.func @transform_1(%arg0: i32) -> (i32, i32) {
    %c0_i32 = arith.constant 0 : i32
    %c0_i32_0 = arith.constant 0 : i32
    %c0_i32_1 = arith.constant 0 : i32
    return %c0_i32, %c0_i32_0 : i32, i32
  }
  func.func @transform_2(%arg0: i32) -> (i32, i32) {
    %c0_i32 = arith.constant 0 : i32
    %c0_i32_0 = arith.constant 0 : i32
    %c0_i32_1 = arith.constant 0 : i32
    return %c0_i32, %c0_i32_0 : i32, i32
  }
  func.func @transform_3(%arg0: i32) -> (i32, i32) {
    %c0_i32 = arith.constant 0 : i32
    %c0_i32_0 = arith.constant 0 : i32
    %c0_i32_1 = arith.constant 0 : i32
    return %c0_i32, %c0_i32_0 : i32, i32
  }
  func.func @transform_4(%arg0: i32) -> (i32, i32) {
    %c0_i32 = arith.constant 0 : i32
    %c0_i32_0 = arith.constant 0 : i32
    %c0_i32_1 = arith.constant 0 : i32
    return %c0_i32, %c0_i32_0 : i32, i32
  }
  func.func @transform_5(%arg0: i32) -> (i32, i32) {
    %c0_i32 = arith.constant 0 : i32
    %c0_i32_0 = arith.constant 0 : i32
    %c0_i32_1 = arith.constant 0 : i32
    return %c0_i32, %c0_i32_0 : i32, i32
  }
  func.func @transform_6(%arg0: i32) -> (i32, i32) {
    %c0_i32 = arith.constant 0 : i32
    %c0_i32_0 = arith.constant 0 : i32
    return %arg0, %c0_i32 : i32, i32
  }
}

</mosaic_0001>

<bundles_post_ra>
// kernel: actor_forward.1
= control target key start
LH: loop header
LB: loop body
LE: loop exit
PB: predicated region body
PF: predicated region fallthrough
CT: control target
= control target key end

     0   :  { %11 = vsyncpa [#allocation3], 0  ;;  %s1377_s0 = inlined_call_operand.vmem [shape: f32[16,8], index: 0, kind: input, shape index: {}]   ;;  %s1378_s1 = inlined_call_operand.hbm [shape: bf16[8,256], index: 1, kind: input, shape index: {}]   ;;  %s1379_s2 = inlined_call_operand.vmem [shape: bf16[256,128], index: 2, kind: input, shape index: {}]   ;;  %s1380_s3 = inlined_call_operand.vmem [shape: bf16[128,64], index: 3, kind: input, shape index: {}]   ;;  %s1381_s4 = inlined_call_operand.hbm [shape: bf16[64,128], index: 4, kind: input, shape index: {}]   ;;  %s1382_s5 = inlined_call_operand.hbm [shape: f32[1,640], index: 5, kind: input, shape index: {}]   ;;  %s1383_s6 = inlined_call_operand.vmem [shape: f32[16,128], index: 6, kind: output, shape index: {}]  }
   0x1   :  { %12 = vsyncpa [#allocation5], 0  ;;  %s1158_s21 = smov 0  }
   0x2 LB: > { %s1115_s22 = smov [#allocation4]   ;;  %s1164_s24 = sadd.s32 4294967295, %s1113_s21   ;;  %s1113_s21 = sphi %s1158_s21, %s18_s21  }
   0x3   : > { %s209_s23 = sshll.u32 %s1115_s22, 4  ;;  %p824_p0 = scmp.ge.s32.totalorder %s1113_s21, 1  ;;  %s1173_s23 = int_to_ptr.vmem [resolvable:$true] %s209_s23 }
   0x4   : > { %p180_p1 = scmp.lt.s32.totalorder %s1113_s21, 3  ;;  %p963_p2 = scmp.eq.s32.totalorder %s1164_s24, 0 }
   0x5   : > { %s1116_s26 = smov [#allocation2]   ;;  %s1117_s29 = smov [#allocation6]  }
   0x6   : > { %p1169_p3 = pnand %p824_p0, %p180_p1  ;;  %s193_s27 = sshll.u32 %s1116_s26, 4  ;;  %s1183_s27 = int_to_ptr.vmem [resolvable:$true] %s193_s27 }
   0x7   : > { %s223_s30 = sshll.u32 %s1117_s29, 4  ;;  %s1015_s9 = scalar_lea.hbm %s1381_s4, 512  ;;  %s1185_s30 = int_to_ptr.vmem [resolvable:$true] %s223_s30 }
   0x8   : > { %p953_p4 = pneg %p1169_p3  ;;  %p1016_p6 = scmp.ne.s32.totalorder %s1381_s4, %s1015_s9 }
   0x9   : > { %p1022_p10 = scmp.lt.u32.totalorder %s1015_s9, %s1381_s4 }
   0xa   : > { %p1179_p5 = pnand %p963_p2, %p953_p4 }
   0xc   : > { %p1195_p7 = pneg %p1179_p5 }
   0xe   : > { %p1018_p8 = pnand %p1195_p7, %p1016_p6 }
  0x10   : > { %p1019_p9 = pneg %p1018_p8 }
  0x12   : > { %p1024_p11 = pnand %p1022_p10, %p1019_p9 }
  0x14   : > { %1027 = shalt.err (!%p1024_p11)
}
  0x15   : > { %s1028_s15 = scalar_lea.vmem %s1173_s23, 512  ;;  %p1036_p1 = scmp.lt.s32.totalorder %s1173_s23, %s1173_s23 }
  0x16   : > { %p1029_p12 = scmp.ne.s32.totalorder %s1173_s23, %s1028_s15  ;;  %p1037_p4 = scmp.lt.s32.totalorder %s1028_s15, %s1028_s15 }
  0x18   : > { %p1031_p13 = pnand %p1029_p12, %p1195_p7  ;;  %p1038_p6 = por %p1037_p4, %p1036_p1 }
  0x1a   : > { %p1032_p0 = pneg %p1031_p13 }
  0x1c   : > { %p1039_p8 = pnand %p1038_p6, %p1032_p0 }
  0x1e   : > { %1042 = shalt.err (!%p1039_p8)
}
  0x1f   : > { %s1118_s16 = smov 64   ;;  %s1119_s17 = smov 4  }
  0x20   : > { %959 = dma.hbm_to_vmem [thread:$0]  (!%p1179_p5), %s1381_s4, 512, %s1173_s23, [#allocation5], %s1118_s16, %s1118_s16, %s1119_s17  }
  0x21   : > { %s1043_s26 = scalar_lea.hbm %s1378_s1, 128 }
  0x22   : > { %p1044_p9 = scmp.ne.s32.totalorder %s1378_s1, %s1043_s26  ;;  %p1050_p12 = scmp.lt.u32.totalorder %s1043_s26, %s1378_s1 }
  0x24   : > { %p1046_p10 = pnand %p1044_p9, %p1195_p7 }
  0x26   : > { %p1047_p11 = pneg %p1046_p10 }
  0x28   : > { %p1052_p13 = pnand %p1050_p12, %p1047_p11 }
  0x2a   : > { %1055 = shalt.err (!%p1052_p13)
}
  0x2b   : > { %s1056_s23 = scalar_lea.vmem %s1183_s27, 128  ;;  %p1064_p6 = scmp.lt.s32.totalorder %s1183_s27, %s1183_s27 }
  0x2c   : > { %p1057_p0 = scmp.ne.s32.totalorder %s1183_s27, %s1056_s23  ;;  %p1065_p8 = scmp.lt.s32.totalorder %s1056_s23, %s1056_s23 }
  0x2e   : > { %p1059_p1 = pnand %p1057_p0, %p1195_p7  ;;  %p1066_p9 = por %p1065_p8, %p1064_p6 }
  0x30   : > { %p1060_p4 = pneg %p1059_p1 }
  0x32   : > { %p1067_p10 = pnand %p1066_p9, %p1060_p4 }
  0x34   : > { %1070 = shalt.err (!%p1067_p10)
}
  0x35   : > { %956 = dma.hbm_to_vmem [thread:$0]  (!%p1179_p5), %s1378_s1, 128, %s1183_s27, [#allocation3]  }
  0x36   : > { %s1071_s15 = scalar_lea.hbm %s1382_s5, 80 }
  0x37   : > { %p1072_p11 = scmp.ne.s32.totalorder %s1382_s5, %s1071_s15  ;;  %p1078_p0 = scmp.lt.u32.totalorder %s1071_s15, %s1382_s5 }
  0x39   : > { %p1074_p12 = pnand %p1072_p11, %p1195_p7 }
  0x3b   : > { %p1075_p13 = pneg %p1074_p12 }
  0x3d   : > { %p1080_p1 = pnand %p1078_p0, %p1075_p13 }
  0x3f   : > { %1083 = shalt.err (!%p1080_p1)
}
  0x40   : > { %s1084_s27 = scalar_lea.vmem %s1185_s30, 80  ;;  %s1091_s20 = scalar_lea.vmem %s1185_s30, 96 }
  0x41   : > { %p1085_p4 = scmp.ne.s32.totalorder %s1185_s30, %s1084_s27  ;;  %p1092_p9 = scmp.lt.s32.totalorder %s1185_s30, %s1185_s30 }
  0x42   : > { %p1093_p10 = scmp.lt.s32.totalorder %s1091_s20, %s1084_s27 }
  0x43   : > { %p1087_p6 = pnand %p1085_p4, %p1195_p7 }
  0x44   : > { %p1094_p11 = por %p1093_p10, %p1092_p9 }
  0x45   : > { %p1088_p8 = pneg %p1087_p6 }
  0x47   : > { %p1095_p12 = pnand %p1094_p11, %p1088_p8 }
  0x49   : > { %1098 = shalt.err (!%p1095_p12)
}
  0x4a   : > { %962 = dma.hbm_to_vmem [thread:$0]  (!%p1179_p5), %s1382_s5, 80, %s1185_s30, [#allocation5]  }
  0x4b   : > { %243 = sbr.rel (%p1169_p3) target bundleno = 967 (0x3c7), region = 44 }
  0x52   : > { %1104 = dma.done.wait (%p963_p2), [#allocation3], 128  }
  0x53   : > { %1106 = vsyncadd (%p963_p2), [#allocation3], 4294967168 }
  0x54   : > { %1108 = dma.done.wait (%p963_p2), [#allocation5], 592  }
  0x55   : > { %1110 = vsyncadd (%p963_p2), [#allocation5], 4294966704  ;;  %p279_p7 = scmp.lt.s32.totalorder %s1164_s24, 1  ;;  %v1120_v0 = vmov 0   ;;  %v290_v1 = vld [vmem:[#allocation2] sm:$0xff]  ;;  %vm312_vm0 = vcmask 1043456   ;;  %v293_v30 = vlaneseq }
  0x56   : > { %351 = vmatprep.mubr.bf16.mxu0 %v1120_v0  ;;  %v836_v3 = vcombine.high %v290_v1, %v290_v1  ;;  %v835_v4 = vcombine.low %v290_v1, %v290_v1  ;;  %v987_v5 = vld [vmem:[%s1379_s2 + $0x40] sm:$0xff]   ;;  %v989_v9 = vld [vmem:[%s1379_s2 + $0x48] sm:$0xff]   ;;  %vm308_vm1 = vcmask 64512   ;;  %v991_v11 = vld [vmem:[%s1379_s2 + $0x50] sm:$0xff]   ;;  %v1121_v24 = vmov 0.0  }
  0x57   : > { %s1388_s24 = smov (!%p279_p7, %s1164_s24), 1  ;;  %v988_v6 = vld [vmem:[%s1379_s2] sm:$0xff]   ;;  %873 = vmatprep.subr.bf16.mxu1 %v987_v5  ;;  %v990_v10 = vld [vmem:[%s1379_s2 + $0x8] sm:$0xff]   ;;  %v992_v12 = vld [vmem:[%s1379_s2 + $0x10] sm:$0xff]   ;;  %v294_v31 = vshrl.u32 %v293_v30, 7  ;;  %vm1122_vm2 = vmmov 0  }
  0x58   : > { %s833_s25 = sshll.u32 %s1388_s24, 3  ;;  %837 = vmatprep.subr.msk.bf16.mxu0 %vm312_vm0, %v836_v3  ;;  %v314_v7 = vsel %vm312_vm0, %v835_v4, 0  ;;  %874 = vmatpush3.bf16.msra.mxu1 %v988_v6  ;;  %v993_v13 = vld [vmem:[%s1379_s2 + $0x58] sm:$0xff]   ;;  %v995_v15 = vld [vmem:[%s1379_s2 + $0x60] sm:$0xff]   ;;  %v997_v17 = vld [vmem:[%s1379_s2 + $0x68] sm:$0xff]   ;;  %vm693_vm3 = vcmask 523264  }
  0x59   : > { %s282_s12 = scalar_lea.vmem %s1377_s0, %s833_s25  ;;  %320 = vmatpush1.bf16.msra.mxu0 %v314_v7  ;;  %875 = vmatprep.subr.bf16.mxu1 %v989_v9  ;;  %v994_v14 = vld [vmem:[%s1379_s2 + $0x18] sm:$0xff]   ;;  %v996_v16 = vld [vmem:[%s1379_s2 + $0x20] sm:$0xff]   ;;  %v998_v18 = vld [vmem:[%s1379_s2 + $0x28] sm:$0xff]   ;;  %v295_v32 = vsub.s32 0, %v294_v31  ;;  %v299_v34 = vsub.s32 1, %v294_v31  ;;  %s286_s14 = scalar_lea.vmem %s1383_s6, %s833_s25 }
  0x5a   : > { %v288_v2 = vld [vmem:[%s282_s12] sm:$0xff]  ;;  %v999_v19 = vld [vmem:[%s1379_s2 + $0x70] sm:$0xff]   ;;  %v1001_v21 = vld [vmem:[%s1379_s2 + $0x78] sm:$0xff]   ;;  %909 = vmatprep.subr.bf16.mxu0 %v1121_v24 }
  0x5b   : > { %v289_v8 = vpack.c.bf16 %v288_v2, %v288_v2  ;;  %v1000_v20 = vld [vmem:[%s1379_s2 + $0x30] sm:$0xff]   ;;  %v1002_v22 = vld [vmem:[%s1379_s2 + $0x38] sm:$0xff]   ;;  %v1003_v23 = vld [vmem:[%s1380_s3] sm:$0xff]  }
  0x5c   : > { %876 = vmatpush3.bf16.msra.mxu1 %v990_v10  ;;  %v1004_v25 = vld [vmem:[%s1380_s3 + $0x8] sm:$0xff]   ;;  %v1005_v26 = vld [vmem:[%s1380_s3 + $0x10] sm:$0xff]   ;;  %v1006_v27 = vld [vmem:[%s1380_s3 + $0x18] sm:$0xff]  }
  0x5d   : > { %838 = vmatmul.mubr.msk.bf16.vlgmr.msra.gmra.mrb[0].mxu0 %vm308_vm1, %v289_v8  ;;  %877 = vmatprep.subr.bf16.mxu1 %v991_v11  ;;  %v1007_v28 = vld [vmem:[%s1380_s3 + $0x20] sm:$0xff]   ;;  %v1008_v29 = vld [vmem:[%s1380_s3 + $0x28] sm:$0xff]   ;;  %v1009_v47 = vld [vmem:[%s1380_s3 + $0x30] sm:$0xff]  }
  0x5e   : > { %910 = vmatpush3.bf16.msra.mxu0 %v1003_v23  ;;  %v291_v33 = vld [vmem:[#allocation6] sm:$0x3]  ;;  %v1010_v48 = vld [vmem:[%s1380_s3 + $0x38] sm:$0xff]   ;;  %925 = vmatprep.mubr.msk.bf16.mxu0 %vm1122_vm2, %v1121_v24  ;;  %v1012_v50 = vld [vmem:[#allocation4 + $0x8] sm:$0xff]  }
  0x5f   : > { %911 = vmatprep.subr.bf16.mxu0 %v1121_v24  ;;  %v296_v35 = vrot.slane %v291_v33, %v295_v32  ;;  %v300_v36 = vrot.slane %v291_v33, %v299_v34  ;;  %v1011_v49 = vld [vmem:[#allocation4] sm:$0xff]   ;;  %v1013_v60 = vld [vmem:[#allocation4 + $0x10] sm:$0xff]   ;;  %v1014_v61 = vld [vmem:[#allocation4 + $0x18] sm:$0xff]  }
  0x60   : > { %878 = vmatpush3.bf16.msra.mxu1 %v992_v12  ;;  %v839_v52 = vld [vmem:[#allocation6 + $0x2] ss:$0 sm:$0xff]  ;;  %v856_v62 = vld [vmem:[#allocation6 + $0x3] ss:$0 sm:$0xff]  ;;  %v865_v6 = vld [vmem:[#allocation6 + $0x4] ss:$0 sm:$0xff] }
  0x61   : > { %879 = vmatprep.subr.bf16.mxu1 %v993_v13 }
  0x62   : > { %912 = vmatpush3.bf16.msra.mxu0 %v1004_v25 }
  0x63   : > { %913 = vmatprep.subr.bf16.mxu0 %v1121_v24 }
  0x64   : > { %880 = vmatpush3.bf16.msra.mxu1 %v994_v14 }
  0x65   : > { %881 = vmatprep.subr.bf16.mxu1 %v995_v15 }
  0x66   : > { %914 = vmatpush3.bf16.msra.mxu0 %v1005_v26 }
  0x67   : > { %915 = vmatprep.subr.bf16.mxu0 %v1121_v24 }
  0x68   : > { %882 = vmatpush3.bf16.msra.mxu1 %v996_v16 }
  0x69   : > { %883 = vmatprep.subr.bf16.mxu1 %v997_v17 }
  0x6a   : > { %916 = vmatpush3.bf16.msra.mxu0 %v1006_v27 }
  0x6b   : > { %917 = vmatprep.subr.bf16.mxu0 %v1121_v24 }
  0x6c   : > { %884 = vmatpush3.bf16.msra.mxu1 %v998_v18 }
  0x6d   : > { %885 = vmatprep.subr.bf16.mxu1 %v999_v19 }
  0x6e   : > { %918 = vmatpush3.bf16.msra.mxu0 %v1007_v28 }
  0x6f   : > { %919 = vmatprep.subr.bf16.mxu0 %v1121_v24 }
  0x70   : > { %886 = vmatpush3.bf16.msra.mxu1 %v1000_v20 }
  0x71   : > { %887 = vmatprep.subr.bf16.mxu1 %v1001_v21 }
  0x72   : > { %920 = vmatpush3.bf16.msra.mxu0 %v1008_v29 }
  0x73   : > { %921 = vmatprep.subr.bf16.mxu0 %v1121_v24 }
  0x74   : > { %888 = vmatpush3.bf16.msra.mxu1 %v1002_v22 }
  0x75   : > { %929 = vmatprep.subr.bf16.mxu1 %v1121_v24 }
  0x76   : > { %922 = vmatpush3.bf16.msra.mxu0 %v1009_v47 }
  0x77   : > { %923 = vmatprep.subr.bf16.mxu0 %v1121_v24 }
  0x7a   : > { %924 = vmatpush3.bf16.msra.mxu0 %v1010_v48 }
 0x130   : > { %v353_v37 = vpop.f32.mrb[0].mxu0 }
 0x131   : > { %v354_v38 = vadd.f32 %v353_v37, %v296_v35  ;;  %v355_v39 = vpop.f32.mrb[1].mxu0 }
 0x132   : > { %v356_v40 = vadd.f32 %v355_v39, %v300_v36  ;;  %v357_v41 = vpop.f32.mrb[2].mxu0 }
 0x133   : > { %v360_v42 = vmax.f32 %v354_v38, 0.0  ;;  %v358_v43 = vpop.f32.mrb[3].mxu0 }
 0x134   : > { %v361_v44 = vmax.f32 %v356_v40, 0.0 }
 0x135   : > { %v362_v46 = vpack.c.bf16 %v360_v42, %v360_v42 }
 0x136   : > { %v363_v45 = vpack.c.bf16 %v361_v44, %v361_v44 }
 0x138   : > { %531 = vmatprep.mubr.bf16.mxu1 %v363_v45 }
 0x139   : > { %532 = vmatmul.mubr.bf16.vlgmr.msra.gmra.mrb[0].mxu1 %v362_v46 }
 0x13a   : > { %937 = vmatprep.mubr.msk.bf16.mxu1 %vm1122_vm2, %v1121_v24  ;;  %930 = vmatpush3.bf16.msra.mxu1 %v1011_v49 }
 0x13b   : > { %931 = vmatprep.subr.bf16.mxu1 %v1121_v24 }
 0x13e   : > { %932 = vmatpush3.bf16.msra.mxu1 %v1012_v50 }
 0x13f   : > { %933 = vmatprep.subr.bf16.mxu1 %v1121_v24 }
 0x142   : > { %934 = vmatpush3.bf16.msra.mxu1 %v1013_v60 }
 0x143   : > { %935 = vmatprep.subr.bf16.mxu1 %v1121_v24 }
 0x146   : > { %936 = vmatpush3.bf16.msra.mxu1 %v1014_v61 }
 0x20c   : > { %v889_v51 = vpop.f32.mrb[0].mxu1 }
 0x20d   : > { %v890_v53 = vpop.f32.mrb[1].mxu1 }
 0x20e   : > { %v891_v54 = vadd.f32 %v890_v53, %v889_v51  ;;  %v892_v55 = vpop.f32.mrb[2].mxu1 }
 0x20f   : > { %v893_v56 = vpop.f32.mrb[3].mxu1 }
 0x210   : > { %v534_v57 = vadd.f32 %v891_v54, %v839_v52 }
 0x212   : > { %v539_v58 = vmax.f32 %v534_v57, 0.0 }
 0x214   : > { %v540_v59 = vpack.c.bf16 %v539_v58, %v539_v58 }
 0x216   : > { %926 = vmatmul.mubr.bf16.vlgmr.msra.gmra.mrb[4].mxu0 %v540_v59 }
 0x2e9   : > { %v646_v63 = vpop.f32.mrb[4].mxu0 }
 0x2ea   : > { %v647_v0 = vadd.f32 %v856_v62, %v646_v63  ;;  %v927_v1 = vpop.f32.mrb[5].mxu0 }
 0x2eb   : > { %v649_v2 = vpop.f32.mrb[6].mxu0 }
 0x2ec   : > { %v652_v3 = vmax.f32 %v647_v0, 0.0  ;;  %v928_v4 = vpop.f32.mrb[7].mxu0 }
 0x2ee   : > { %v653_v5 = vpack.c.bf16 %v652_v3, %v652_v3 }
 0x2f0   : > { %938 = vmatmul.mubr.msk.bf16.vlgmr.msra.gmra.mrb[4].mxu1 %vm693_vm3, %v653_v5 }
 0x3c3   : > { %v731_v7 = vpop.f32.mrb[4].mxu1 }
 0x3c4   : > { %v732_v8 = vadd.f32 %v865_v6, %v731_v7  ;;  %v939_v9 = vpop.f32.mrb[5].mxu1 }
 0x3c5   : > { %v734_v10 = vpop.f32.mrb[6].mxu1 }
 0x3c6   : > { %737 = vst [vmem:[%s286_s14] sm:$0xff] %v732_v8  ;;  %v940_v11 = vpop.f32.mrb[7].mxu1 }
 0x3c7 PF: > { %s18_s21 = sadd.s32 1, %s1113_s21  }
 0x3c8   : > { %p15_p2 = scmp.ge.s32.totalorder %s18_s21, 4  }
 0x3ca   :  { %17 = sbr.rel (!%p15_p2) target bundleno = 2 (0x2), region = 87 }
 0x3d1   :  { %757 = vsyncpa [#allocation3], 1 }
 0x3d2   :  { %759 = vsyncpa [#allocation3 + $0x1], 1 }
 0x3d3   :  { %760 = vsyncpa [#allocation5], 1 }

</bundles_post_ra>
